<compile_context>
chip_gen: v7x
topology: tpu7x:2x2x1
jax: 0.10.0
libtpu: 0.0.40
codegen_flags: <defaults>
</compile_context>

<pallas_src>
import numpy as np

import jax
import jax.numpy as jnp
from jax.experimental import pallas as pl
from jax.experimental.pallas import tpu as pltpu


# ----------------------------------------------------------------------------
# Block-size helper
# ----------------------------------------------------------------------------
def _pick_block(n, align, target):
    """Largest multiple of `align` that divides n and is <= target; else n (full extent)."""
    if n % align != 0 or n <= align:
        return n
    best = align
    t = align
    limit = min(n, target)
    while t <= limit:
        if n % t == 0:
            best = t
        t += align
    return best


# ----------------------------------------------------------------------------
# Pallas kernels
# ----------------------------------------------------------------------------
def _row_stats_kernel(x_ref, sum_ref, sq_ref):
    """Accumulate per-row sum and sum-of-squares across the column (lane) grid axis.

    x_ref: (tr, tn) tile of the (B*C, H*W) view; sum_ref/sq_ref: (tr, 1) accumulators
    (same output block across the column axis => VMEM-resident accumulator).
    """
    @pl.when(pl.program_id(1) == 0)
    def _():
        sum_ref[...] = jnp.zeros_like(sum_ref)
        sq_ref[...] = jnp.zeros_like(sq_ref)

    x = x_ref[...].astype(jnp.float32)
    sum_ref[...] += jnp.sum(x, axis=1, keepdims=True)
    sq_ref[...] += jnp.sum(x * x, axis=1, keepdims=True)


def _actnorm_apply_kernel(x_ref, loc_ref, scale_ref, out_ref):
    """out = scale * (x + loc), per-row loc/scale broadcast across the lane axis."""
    x = x_ref[...].astype(jnp.float32)
    out_ref[...] = ((x + loc_ref[...]) * scale_ref[...]).astype(out_ref.dtype)


# ----------------------------------------------------------------------------
# Wrapper
# ----------------------------------------------------------------------------
def actnorm_forward(x_nchw, loc=None, scale=None):
    """ActNorm.forward.  If loc/scale are None, runs the data-dependent init path
    (first call) and also returns the initialized loc/scale.
    Returns (out_nchw, logdet_scalar, loc (C,), scale (C,))."""
    # TODO(synk): the module's `initialized` buffer / in-place nn.Parameter update is
    # host-side module state; we return loc/scale instead of mutating parameters.
    B, C, H, W = x_nchw.shape
    R, N = B * C, H * W
    M = B * H * W

    # Free, NCHW-contiguous view: rows = (batch, channel), columns = spatial.
    x2 = x_nchw.reshape(R, N)

    tr = _pick_block(R, 8, 128)      # sublane-dense row block (or full extent)
    tn = _pick_block(N, 128, 1024)   # lane-dense column block (or full extent)
    grid = (R // tr, N // tn)

    x_spec = pl.BlockSpec((tr, tn), lambda i, j: (i, j))
    vec_spec = pl.BlockSpec((tr, 1), lambda i, j: (i, 0))

    if loc is None:
        # --- Pass 1: streamed per-row statistics ---------------------------------
        row_sum, row_sq = pl.pallas_call(
            _row_stats_kernel,
            out_shape=(jax.ShapeDtypeStruct((R, 1), jnp.float32),
                       jax.ShapeDtypeStruct((R, 1), jnp.float32)),
            grid=grid,
            in_specs=[x_spec],
            out_specs=(vec_spec, vec_spec),
            compiler_params=pltpu.CompilerParams(
                dimension_semantics=("parallel", "arbitrary")),
        )(x2)
        # Finalize per-channel stats in plain JAX (C-length vectors, negligible).
        ch_sum = row_sum.reshape(B, C).sum(axis=0)
        ch_sq = row_sq.reshape(B, C).sum(axis=0)
        mean = ch_sum / M
        var = (ch_sq - M * mean * mean) / (M - 1.0)   # unbiased, matches torch std()
        loc_c = -mean
        scale_c = 1.0 / (jnp.sqrt(var) + 1e-6)
    else:
        loc_c = jnp.asarray(loc, jnp.float32).reshape(C)
        scale_c = jnp.asarray(scale, jnp.float32).reshape(C)

    # logdet only depends on the C-length scale vector — plain JAX, no kernel output.
    logdet = (H * W) * jnp.sum(jnp.log(jnp.abs(scale_c)))

    # Tiny per-row expansion of the per-channel parameters (row r -> channel r % C).
    loc_rows = jnp.tile(loc_c, (B,)).reshape(R, 1)
    scale_rows = jnp.tile(scale_c, (B,)).reshape(R, 1)

    # --- Pass 2: tiled, double-buffered affine apply ------------------------------
    out2 = pl.pallas_call(
        _actnorm_apply_kernel,
        out_shape=jax.ShapeDtypeStruct((R, N), x_nchw.dtype),
        grid=grid,
        in_specs=[x_spec, vec_spec, vec_spec],
        out_specs=x_spec,
        compiler_params=pltpu.CompilerParams(
            dimension_semantics=("parallel", "parallel")),
    )(x2, loc_rows, scale_rows)

    out = out2.reshape(B, C, H, W)   # free view back to NCHW
    return out, logdet, loc_c, scale_c


# ----------------------------------------------------------------------------
# Pure-JAX reference (mirrors the PyTorch ActNorm.forward, first call)
# ----------------------------------------------------------------------------
def actnorm_reference(x):
    B, C, H, W = x.shape
    flat = jnp.transpose(x, (1, 0, 2, 3)).reshape(C, -1)
    mean = flat.mean(axis=1)
    std = jnp.std(flat, axis=1, ddof=1)                 # torch unbiased std
    loc = -mean
    scale = 1.0 / (std + 1e-6)
    out = scale[None, :, None, None] * (x + loc[None, :, None, None])
    logdet = H * W * jnp.sum(jnp.log(jnp.abs(scale)))
    return out, logdet, loc, scale


if __name__ == "__main__":
    key = jax.random.PRNGKey(0)
    B, C, H, W = 2, 4, 16, 16
    x = jax.random.normal(key, (B, C, H, W), jnp.float32)

    # First forward call: data-dependent initialization path.
    out, logdet, loc, scale = actnorm_forward(x)
    out = jax.block_until_ready(out)
    logdet = jax.block_until_ready(logdet)

    ref_out, ref_logdet, ref_loc, ref_scale = actnorm_reference(x)
    np.testing.assert_allclose(np.asarray(out), np.asarray(ref_out), rtol=1e-4, atol=1e-4)
    np.testing.assert_allclose(np.asarray(logdet), np.asarray(ref_logdet), rtol=1e-4, atol=1e-4)
    np.testing.assert_allclose(np.asarray(loc), np.asarray(ref_loc), rtol=1e-4, atol=1e-4)
    np.testing.assert_allclose(np.asarray(scale), np.asarray(ref_scale), rtol=1e-4, atol=1e-4)

    # Second forward call: already-initialized path reusing loc/scale.
    out2, logdet2, _, _ = actnorm_forward(x, loc=loc, scale=scale)
    out2 = jax.block_until_ready(out2)
    np.testing.assert_allclose(np.asarray(out2), np.asarray(ref_out), rtol=1e-4, atol=1e-4)
    np.testing.assert_allclose(np.asarray(logdet2), np.asarray(ref_logdet), rtol=1e-4, atol=1e-4)

    print("KERNEL_OK")
</pallas_src>

<mosaic_0001>
module attributes {stable_mosaic.version = 11 : i64} {
  func.func @_row_stats_kernel(%arg0: i32, %arg1: i32, %arg2: memref<8x256xf32, #tpu.memory_space<vmem>>, %arg3: memref<8x1xf32, #tpu.memory_space<vmem>>, %arg4: memref<8x1xf32, #tpu.memory_space<vmem>>) attributes {dimension_semantics = [#tpu.dimension_semantics<parallel>, #tpu.dimension_semantics<arbitrary>], iteration_bounds = array<i64: 1, 1>, scalar_prefetch = 0 : i64, scratch_operands = 0 : i64, tpu.core_type = #tpu.core_type<tc>, window_params = [{transform_indices = @transform_0, window_bounds = array<i64: 8, 256>}, {transform_indices = @transform_1, window_bounds = array<i64: 8, 1>}, {transform_indices = @transform_2, window_bounds = array<i64: 8, 1>}]} {
    %c0_i32 = arith.constant 0 : i32
    %0 = arith.cmpi eq, %arg1, %c0_i32 : i32
    %1 = arith.extui %0 : i1 to i32
    %c0_i32_0 = arith.constant 0 : i32
    %2 = arith.cmpi ne, %1, %c0_i32_0 : i32
    scf.if %2 {
      %cst_11 = arith.constant 0.000000e+00 : f32
      %15 = vector.broadcast %cst_11 : f32 to vector<8x1xf32>
      %c0_12 = arith.constant 0 : index
      %c0_13 = arith.constant 0 : index
      %16 = vector.load %arg3[%c0_12, %c0_13] : memref<8x1xf32, #tpu.memory_space<vmem>>, vector<8x1xf32>
      tpu.vector_store %arg3[%c0_12, %c0_13], %15 {strides = array<i32>} : memref<8x1xf32, #tpu.memory_space<vmem>>, vector<8x1xf32>,
      %cst_14 = arith.constant 0.000000e+00 : f32
      %17 = vector.broadcast %cst_14 : f32 to vector<8x1xf32>
      %c0_15 = arith.constant 0 : index
      %c0_16 = arith.constant 0 : index
      %18 = vector.load %arg4[%c0_15, %c0_16] : memref<8x1xf32, #tpu.memory_space<vmem>>, vector<8x1xf32>
      tpu.vector_store %arg4[%c0_15, %c0_16], %17 {strides = array<i32>} : memref<8x1xf32, #tpu.memory_space<vmem>>, vector<8x1xf32>,
    } else {
    }
    %c0 = arith.constant 0 : index
    %c0_1 = arith.constant 0 : index
    %3 = vector.load %arg2[%c0, %c0_1] : memref<8x256xf32, #tpu.memory_space<vmem>>, vector<8x256xf32>
    %c0_2 = arith.constant 0 : index
    %c0_3 = arith.constant 0 : index
    %4 = vector.load %arg3[%c0_2, %c0_3] : memref<8x1xf32, #tpu.memory_space<vmem>>, vector<8x1xf32>
    %cst = arith.constant dense<0.000000e+00> : vector<8xf32>
    %5 = vector.multi_reduction <add>, %3, %cst [1] : vector<8x256xf32> to vector<8xf32>
    %6 = vector.shape_cast %5 : vector<8xf32> to vector<8x1xf32>
    %7 = arith.addf %4, %6 : vector<8x1xf32>
    %c0_4 = arith.constant 0 : index
    %c0_5 = arith.constant 0 : index
    %8 = vector.load %arg3[%c0_4, %c0_5] : memref<8x1xf32, #tpu.memory_space<vmem>>, vector<8x1xf32>
    tpu.vector_store %arg3[%c0_4, %c0_5], %7 {strides = array<i32>} : memref<8x1xf32, #tpu.memory_space<vmem>>, vector<8x1xf32>,
    %c0_6 = arith.constant 0 : index
    %c0_7 = arith.constant 0 : index
    %9 = vector.load %arg4[%c0_6, %c0_7] : memref<8x1xf32, #tpu.memory_space<vmem>>, vector<8x1xf32>
    %10 = arith.mulf %3, %3 : vector<8x256xf32>
    %cst_8 = arith.constant dense<0.000000e+00> : vector<8xf32>
    %11 = vector.multi_reduction <add>, %10, %cst_8 [1] : vector<8x256xf32> to vector<8xf32>
    %12 = vector.shape_cast %11 : vector<8xf32> to vector<8x1xf32>
    %13 = arith.addf %9, %12 : vector<8x1xf32>
    %c0_9 = arith.constant 0 : index
    %c0_10 = arith.constant 0 : index
    %14 = vector.load %arg4[%c0_9, %c0_10] : memref<8x1xf32, #tpu.memory_space<vmem>>, vector<8x1xf32>
    tpu.vector_store %arg4[%c0_9, %c0_10], %13 {strides = array<i32>} : memref<8x1xf32, #tpu.memory_space<vmem>>, vector<8x1xf32>,
    return
  }
  func.func @transform_0(%arg0: i32, %arg1: i32) -> (i32, i32) {
    %c0_i32 = arith.constant 0 : i32
    return %arg0, %arg1 : i32, i32
  }
  func.func @transform_1(%arg0: i32, %arg1: i32) -> (i32, i32) {
    %c0_i32 = arith.constant 0 : i32
    %c0_i32_0 = arith.constant 0 : i32
    return %arg0, %c0_i32 : i32, i32
  }
  func.func @transform_2(%arg0: i32, %arg1: i32) -> (i32, i32) {
    %c0_i32 = arith.constant 0 : i32
    %c0_i32_0 = arith.constant 0 : i32
    return %arg0, %c0_i32 : i32, i32
  }
}

</mosaic_0001>

<bundles_post_ra>
// kernel: tpu_custom_call.1
= control target key start
LH: loop header
LB: loop body
LE: loop exit
PB: predicated region body
PF: predicated region fallthrough
CT: control target
= control target key end

     0   :  { %8 = vsyncpa [#allocation3], 0  ;;  %s81_s9 = smov [#allocation2]   ;;  %s132_s0 = inlined_call_operand.hbm [shape: f32[8,256], index: 0, kind: input, shape index: {}]   ;;  %s133_s1 = inlined_call_operand.vmem [shape: f32[8,1], index: 1, kind: output, shape index: {0}]   ;;  %s134_s2 = inlined_call_operand.vmem [shape: f32[8,1], index: 2, kind: output, shape index: {1}]  }
   0x1   :  { %s15_s10 = sshll.u32 %s81_s9, 4  ;;  %s57_s13 = scalar_lea.hbm %s132_s0, 256  ;;  %s16_s10 = int_to_ptr.vmem [resolvable:$true] %s15_s10 }
   0x2   :  { %p58_p0 = scmp.ne.s32.totalorder %s132_s0, %s57_s13  ;;  %p61_p1 = scmp.lt.u32.totalorder %s57_s13, %s132_s0 }
   0x4   :  { %p63_p2 = pnand %p61_p1, %p58_p0 }
   0x6   :  { %66 = shalt.err (!%p63_p2)
}
   0x7   :  { %s67_s18 = scalar_lea.vmem %s16_s10, 256  ;;  %p72_p4 = scmp.lt.s32.totalorder %s16_s10, %s16_s10 }
   0x8   :  { %p68_p3 = scmp.ne.s32.totalorder %s16_s10, %s67_s18  ;;  %p73_p5 = scmp.lt.s32.totalorder %s67_s18, %s67_s18 }
   0xa   :  { %p74_p6 = por %p73_p5, %p72_p4 }
   0xc   :  { %p75_p7 = pnand %p74_p6, %p68_p3 }
   0xe   :  { %78 = shalt.err (!%p75_p7)
}
   0xf   :  { %18 = dma.hbm_to_vmem [thread:$0]  %s132_s0, 256, %s16_s10, [#allocation3]  }
  0x10   :  { %79 = dma.done.wait [#allocation3], 256  }
  0x11   :  { %80 = vsyncadd [#allocation3], 4294967040  ;;  %vm26_vm0 = vcmask 7168   ;;  %v82_v0 = vmov 0.0   ;;  %v29_v1 = vld [vmem:[#allocation2] sm:$0xff]  ;;  %v30_v2 = vld [vmem:[#allocation2 + $0x8] sm:$0xff] }
  0x12   :  { %27 = vst.msk [vmem:[%s133_s1] sm:$0xff] %vm26_vm0, %v82_v0  ;;  %28 = vst.msk [vmem:[%s134_s2] sm:$0xff] %vm26_vm0, %v82_v0  ;;  %v32_v3 = vadd.f32 %v30_v2, %v29_v1  ;;  %v39_v4 = vmul.f32 %v29_v1, %v29_v1  ;;  %v40_v5 = vmul.f32 %v30_v2, %v30_v2 }
  0x14   :  { %33 = vadd.xlane.f32.xlu0 %v32_v3  ;;  %v41_v6 = vadd.f32 %v40_v5, %v39_v4 }
  0x18   :  { %42 = vadd.xlane.f32.xlu0 %v41_v6 }
  0x19   :  { %v31_v7 = vld [vmem:[%s133_s1] sm:$0xff] }
  0x1a   :  { %v38_v10 = vld [vmem:[%s134_s2] sm:$0xff] }
  0xa1   :  { %v34_v8 = vpop.xlane.xlu0 %33 }
  0xa2   :  { %v35_v9 = vadd.f32 %v34_v8, %v31_v7 }
  0xa4   :  { %37 = vst.msk [vmem:[%s133_s1] sm:$0xff] %vm26_vm0, %v35_v9 }
  0xa5   :  { %v43_v11 = vpop.xlane.xlu0 %42 }
  0xa6   :  { %v44_v12 = vadd.f32 %v43_v11, %v38_v10 }
  0xa8   :  { %45 = vst.msk [vmem:[%s134_s2] sm:$0xff] %vm26_vm0, %v44_v12 }
  0xa9   :  { %54 = vsyncpa [#allocation3], 1 }

</bundles_post_ra>
